<compile_context>
chip_gen: v7x
topology: tpu7x:2x2x1
jax: 0.10.0
libtpu: 0.0.40
codegen_flags: <defaults>
</compile_context>

<pallas_src>
import jax
import jax.numpy as jnp
from jax.experimental import pallas as pl
from jax.experimental.pallas import tpu as pltpu


# --------------------------------------------------------------------------- kernel
def gated_attn_pool_kernel(x_ref, w_ref, b_ref, wc_ref, o_ref):
    # x_ref : (bt, T, F) f32 or bf16     w_ref : (F, 2H) bf16
    # b_ref : (1, 2H) f32                wc_ref: (1, H)  f32
    # o_ref : (bt, F) f32
    bt, t, f = x_ref.shape
    h_dim = wc_ref.shape[1]

    x = x_ref[...]                                     # (bt, T, F)
    x2 = x.reshape(bt * t, f)                          # (bt*T, F)

    # Fused projection: one bf16 MXU matmul -> (bt*T, 2H), f32 accumulation.
    z = jnp.dot(x2.astype(jnp.bfloat16), w_ref[...],
                preferred_element_type=jnp.float32) + b_ref[...]

    h = jnp.tanh(z[:, :h_dim])                         # (bt*T, H)
    g = jax.nn.sigmoid(z[:, h_dim:])                   # (bt*T, H)
    hg = h * g

    # scores = context(H*Gate): lane reduction (avoids a lane-dim-1 matmul).
    # Context bias omitted: softmax is shift-invariant.
    scores = jnp.sum(hg * wc_ref[...], axis=-1, keepdims=True)   # (bt*T, 1)
    scores = scores.reshape(bt, t, 1)                            # (bt, T, 1)

    # Per-row softmax over the sequence axis.
    m = jnp.max(scores, axis=1, keepdims=True)                   # (bt, 1, 1)
    e = jnp.exp(scores - m)
    w = e * pl.reciprocal(jnp.sum(e, axis=1, keepdims=True), approx=True)

    # Weighted sum over T in f32 -> (bt, F).
    o_ref[...] = jnp.sum(w * x.astype(jnp.float32), axis=1).astype(o_ref.dtype)


# ------------------------------------------------------------------- param fusion
def prepare_gated_attn_params(wv, bv, wu, bu, wc):
    """One-time parameter prep (hoist out of the forward path).

    Inputs use (in_features, hidden) layout, i.e. the transpose of PyTorch's
    Linear.weight. Returns (w_fused bf16 (F,2H), b_fused f32 (1,2H), wc2 f32 (1,H)).
    """
    f, h = wv.shape
    w_fused = jnp.concatenate([wv, wu], axis=1).astype(jnp.bfloat16)          # (F, 2H)
    b_fused = jnp.concatenate([bv, bu]).reshape(1, 2 * h).astype(jnp.float32)  # (1, 2H)
    wc2 = wc.reshape(1, h).astype(jnp.float32)                                 # (1, H)
    return w_fused, b_fused, wc2


# ---------------------------------------------------------------------- tiling pick
def _round_up(n, m):
    return (n + m - 1) // m * m


def _pick_batch_tile(B, T, F, itemsize, *, target_block_bytes=1 << 20, max_bt=2048):
    """Rows of x per grid step: multiple of 8, sized for the HBM roofline."""
    if B <= 8:
        return B                                   # single full-dim block (always legal)
    row_bytes = T * F * itemsize
    bt = (target_block_bytes // max(row_bytes, 1)) // 8 * 8
    bt = int(max(8, min(bt, max_bt)))
    bt = min(bt, _round_up(B, 8))
    # Prefer >= 2 grid steps so the batch axis can shard across v7x's two TensorCores.
    if pl.cdiv(B, bt) < 2 and B >= 16:
        bt = max(8, (B // 2) // 8 * 8)
    # Prefer a bt that divides B exactly: no ragged boundary block at all.
    if B % bt:
        for cand in range(bt, 7, -8):
            if B % cand == 0:
                bt = cand
                break
    # Tiny/awkward batches: one full-dim block (avoids block_dim > array_dim).
    if B % bt and pl.cdiv(B, bt) == 1:
        bt = B
    return bt


# -------------------------------------------------------------------------- wrapper
def gated_attention_pooling_1d(x, w_fused, b_fused, wc2, *, bt=None):
    """x: (B, T, F) f32 or bf16; fused params from prepare_gated_attn_params().

    Returns (B, F) float32. Exactly matches the PyTorch module's forward (the context
    bias is a softmax shift and therefore has no effect on the output).
    """
    B, T, F = x.shape
    two_h = w_fused.shape[1]
    H = wc2.shape[1]
    assert two_h == 2 * H

    itemsize = x.dtype.itemsize
    if bt is None:
        bt = _pick_batch_tile(B, T, F, itemsize)
    else:
        bt = min(max(8, _round_up(bt, 8)), _round_up(B, 8)) if B > 8 else B
    assert bt == B or bt % 8 == 0
    n_blocks = pl.cdiv(B, bt)

    # VMEM budget: double-buffered x block + bf16 copy + z/h/g temps + weights + out.
    x_block_bytes = bt * T * F * itemsize
    vmem_limit = int(min(48 << 20, max(32 << 20, 6 * x_block_bytes + (4 << 20))))

    cost = pl.CostEstimate(
        flops=int(2 * B * T * F * two_h + 2 * B * T * F + 4 * B * T * H),
        transcendentals=int(B * T * (2 * H + 1)),
        bytes_accessed=int(B * T * F * itemsize + F * two_h * 2
                           + two_h * 4 + H * 4 + B * F * 4),
    )

    out = pl.pallas_call(
        gated_attn_pool_kernel,
        out_shape=jax.ShapeDtypeStruct((B, F), jnp.float32),
        grid_spec=pltpu.PrefetchScalarGridSpec(
            num_scalar_prefetch=0,
            grid=(n_blocks,),
            in_specs=[
                pl.BlockSpec((bt, T, F), lambda b: (b, 0, 0)),     # x (streamed)
                pl.BlockSpec((F, two_h), lambda b: (0, 0)),        # fused Wv|Wu (bf16)
                pl.BlockSpec((1, two_h), lambda b: (0, 0)),        # fused bias
                pl.BlockSpec((1, H), lambda b: (0, 0)),            # context weight
            ],
            out_specs=pl.BlockSpec((bt, F), lambda b: (b, 0)),
        ),
        compiler_params=pltpu.CompilerParams(
            dimension_semantics=("parallel",),
            vmem_limit_bytes=vmem_limit,
        ),
        cost_estimate=cost,
    )(x, w_fused, b_fused, wc2)

    return out


# ------------------------------------------------------------------------ reference
def _reference(x, wv, bv, wu, bu, wc, bc):
    h = jnp.tanh(x @ wv + bv)
    g = jax.nn.sigmoid(x @ wu + bu)
    hg = h * g
    scores = hg @ wc.reshape(-1, 1) + bc                   # (B, T, 1)
    w = jax.nn.softmax(scores[..., 0], axis=1)[..., None]
    return jnp.sum(w * x, axis=1)


if __name__ == "__main__":
    # Small but lane-dense shapes: batch=16, seq=8, in_features=128, hidden=32.
    B, T, F, H = 16, 8, 128, 32
    key = jax.random.PRNGKey(0)
    kx, kv, kbv, ku, kbu, kc, kbc = jax.random.split(key, 7)

    x = jax.random.normal(kx, (B, T, F), dtype=jnp.float32)
    # Parameters stored in (in_features, hidden) layout = PyTorch weight.T
    wv = jax.random.normal(kv, (F, H), dtype=jnp.float32) * 0.1
    bv = jax.random.normal(kbv, (H,), dtype=jnp.float32) * 0.1
    wu = jax.random.normal(ku, (F, H), dtype=jnp.float32) * 0.1
    bu = jax.random.normal(kbu, (H,), dtype=jnp.float32) * 0.1
    wc = jax.random.normal(kc, (H,), dtype=jnp.float32) * 0.1
    bc = jax.random.normal(kbc, (1,), dtype=jnp.float32) * 0.1

    # Parameter fusion happens once, outside the forward path.
    fused = prepare_gated_attn_params(wv, bv, wu, bu, wc)

    out = gated_attention_pooling_1d(x, *fused)
    out = jax.block_until_ready(out)

    ref = _reference(x, wv, bv, wu, bu, wc, bc)
    assert out.shape == (B, F)
    # bf16 MXU projection (f32 accumulation / activations) -> slightly loose tolerance.
    max_err = float(jnp.max(jnp.abs(out - ref)))
    assert jnp.allclose(out, ref, atol=2e-2, rtol=2e-2), max_err
    print("KERNEL_OK")
</pallas_src>

<mosaic_0001>
module attributes {stable_mosaic.version = 11 : i64} {
  func.func @gated_attn_pool_kernel(%arg0: i32, %arg1: memref<8x8x128xf32, #tpu.memory_space<vmem>>, %arg2: memref<128x64xbf16, #tpu.memory_space<vmem>>, %arg3: memref<1x64xf32, #tpu.memory_space<vmem>>, %arg4: memref<1x32xf32, #tpu.memory_space<vmem>>, %arg5: memref<8x128xf32, #tpu.memory_space<vmem>>) attributes {dimension_semantics = [#tpu.dimension_semantics<parallel>], iteration_bounds = array<i64: 2>, scalar_prefetch = 0 : i64, scratch_operands = 0 : i64, tpu.core_type = #tpu.core_type<tc>, window_params = [{transform_indices = @transform_0, window_bounds = array<i64: 8, 8, 128>}, {pipeline_mode = #tpu.pipeline_mode<synchronous>, transform_indices = @transform_1, window_bounds = array<i64: 128, 64>}, {pipeline_mode = #tpu.pipeline_mode<synchronous>, transform_indices = @transform_2, window_bounds = array<i64: 1, 64>}, {pipeline_mode = #tpu.pipeline_mode<synchronous>, transform_indices = @transform_3, window_bounds = array<i64: 1, 32>}, {transform_indices = @transform_4, window_bounds = array<i64: 8, 128>}]} {
    %c0 = arith.constant 0 : index
    %c0_0 = arith.constant 0 : index
    %c0_1 = arith.constant 0 : index
    %0 = vector.load %arg1[%c0, %c0_0, %c0_1] : memref<8x8x128xf32, #tpu.memory_space<vmem>>, vector<8x8x128xf32>
    %1 = vector.shape_cast %0 : vector<8x8x128xf32> to vector<64x128xf32>
    %2 = arith.truncf %1 : vector<64x128xf32> to vector<64x128xbf16>
    %c0_2 = arith.constant 0 : index
    %c0_3 = arith.constant 0 : index
    %3 = vector.load %arg2[%c0_2, %c0_3] : memref<128x64xbf16, #tpu.memory_space<vmem>>, vector<128x64xbf16>
    %cst = arith.constant dense<0.000000e+00> : vector<64x64xf32>
    %4 = tpu.matmul %2, %3, %cst {dimension_numbers = #tpu.dot_dimension_numbers<[1], [0], [0], [1], [0, 0, 1, 1], [], []>} : vector<64x128xbf16>, vector<128x64xbf16>, vector<64x64xf32> -> vector<64x64xf32>
    %c0_4 = arith.constant 0 : index
    %c0_5 = arith.constant 0 : index
    %5 = vector.load %arg3[%c0_4, %c0_5] : memref<1x64xf32, #tpu.memory_space<vmem>>, vector<1x64xf32>
    %6 = vector.broadcast %5 : vector<1x64xf32> to vector<64x64xf32>
    %7 = arith.addf %4, %6 : vector<64x64xf32>
    %8 = vector.extract_strided_slice %7 {offsets = [0, 0], sizes = [64, 32], strides = [1, 1]} : vector<64x64xf32> to vector<64x32xf32>
    %9 = math.tanh %8 : vector<64x32xf32>
    %10 = vector.extract_strided_slice %7 {offsets = [0, 32], sizes = [64, 32], strides = [1, 1]} : vector<64x64xf32> to vector<64x32xf32>
    %11 = arith.negf %10 : vector<64x32xf32>
    %12 = math.exp %11 : vector<64x32xf32>
    %cst_6 = arith.constant 1.000000e+00 : f32
    %13 = vector.broadcast %cst_6 : f32 to vector<64x32xf32>
    %14 = arith.addf %13, %12 : vector<64x32xf32>
    %15 = arith.divf %13, %14 : vector<64x32xf32>
    %16 = arith.mulf %9, %15 : vector<64x32xf32>
    %c0_7 = arith.constant 0 : index
    %c0_8 = arith.constant 0 : index
    %17 = vector.load %arg4[%c0_7, %c0_8] : memref<1x32xf32, #tpu.memory_space<vmem>>, vector<1x32xf32>
    %18 = vector.broadcast %17 : vector<1x32xf32> to vector<64x32xf32>
    %19 = arith.mulf %16, %18 : vector<64x32xf32>
    %cst_9 = arith.constant dense<0.000000e+00> : vector<64xf32>
    %20 = vector.multi_reduction <add>, %19, %cst_9 [1] : vector<64x32xf32> to vector<64xf32>
    %21 = vector.shape_cast %20 : vector<64xf32> to vector<64x1xf32>
    %22 = vector.shape_cast %21 : vector<64x1xf32> to vector<8x8x1xf32>
    %cst_10 = arith.constant dense<0xFF800000> : vector<8x1xf32>
    %23 = vector.multi_reduction <maximumf>, %22, %cst_10 [1] : vector<8x8x1xf32> to vector<8x1xf32>
    %24 = vector.shape_cast %23 : vector<8x1xf32> to vector<8x1x1xf32>
    %25 = vector.broadcast %24 : vector<8x1x1xf32> to vector<8x8x1xf32>
    %26 = arith.subf %22, %25 : vector<8x8x1xf32>
    %27 = math.exp %26 : vector<8x8x1xf32>
    %cst_11 = arith.constant dense<0.000000e+00> : vector<8x1xf32>
    %28 = vector.multi_reduction <add>, %27, %cst_11 [1] : vector<8x8x1xf32> to vector<8x1xf32>
    %29 = vector.shape_cast %28 : vector<8x1xf32> to vector<8x1x1xf32>
    %30 = tpu.reciprocal %29 {approx = true} : vector<8x1x1xf32> -> vector<8x1x1xf32>
    %31 = vector.broadcast %30 : vector<8x1x1xf32> to vector<8x8x1xf32>
    %32 = arith.mulf %27, %31 : vector<8x8x1xf32>
    %33 = vector.broadcast %32 : vector<8x8x1xf32> to vector<8x8x128xf32>
    %34 = arith.mulf %33, %0 : vector<8x8x128xf32>
    %cst_12 = arith.constant dense<0.000000e+00> : vector<8x128xf32>
    %35 = vector.multi_reduction <add>, %34, %cst_12 [1] : vector<8x8x128xf32> to vector<8x128xf32>
    %c0_13 = arith.constant 0 : index
    %c0_14 = arith.constant 0 : index
    %36 = vector.load %arg5[%c0_13, %c0_14] : memref<8x128xf32, #tpu.memory_space<vmem>>, vector<8x128xf32>
    tpu.vector_store %arg5[%c0_13, %c0_14], %35 {strides = array<i32>} : memref<8x128xf32, #tpu.memory_space<vmem>>, vector<8x128xf32>,
    return
  }
  func.func @transform_0(%arg0: i32) -> (i32, i32, i32) {
    %c0_i32 = arith.constant 0 : i32
    %c0_i32_0 = arith.constant 0 : i32
    %c0_i32_1 = arith.constant 0 : i32
    return %arg0, %c0_i32, %c0_i32_0 : i32, i32, i32
  }
  func.func @transform_1(%arg0: i32) -> (i32, i32) {
    %c0_i32 = arith.constant 0 : i32
    %c0_i32_0 = arith.constant 0 : i32
    %c0_i32_1 = arith.constant 0 : i32
    return %c0_i32, %c0_i32_0 : i32, i32
  }
  func.func @transform_2(%arg0: i32) -> (i32, i32) {
    %c0_i32 = arith.constant 0 : i32
    %c0_i32_0 = arith.constant 0 : i32
    %c0_i32_1 = arith.constant 0 : i32
    return %c0_i32, %c0_i32_0 : i32, i32
  }
  func.func @transform_3(%arg0: i32) -> (i32, i32) {
    %c0_i32 = arith.constant 0 : i32
    %c0_i32_0 = arith.constant 0 : i32
    %c0_i32_1 = arith.constant 0 : i32
    return %c0_i32, %c0_i32_0 : i32, i32
  }
  func.func @transform_4(%arg0: i32) -> (i32, i32) {
    %c0_i32 = arith.constant 0 : i32
    %c0_i32_0 = arith.constant 0 : i32
    return %arg0, %c0_i32 : i32, i32
  }
}

</mosaic_0001>

<bundles_post_ra>
// kernel: tpu_custom_call.1
= control target key start
LH: loop header
LB: loop body
LE: loop exit
PB: predicated region body
PF: predicated region fallthrough
CT: control target
= control target key end

     0   :  { %9 = vsyncpa [#allocation3], 0  ;;  %s1456_s0 = inlined_call_operand.hbm [shape: f32[16,8,128], index: 0, kind: input, shape index: {}]   ;;  %s1457_s1 = inlined_call_operand.vmem [shape: bf16[128,64], index: 1, kind: input, shape index: {}]   ;;  %s1458_s2 = inlined_call_operand.vmem [shape: f32[1,64], index: 2, kind: input, shape index: {}]   ;;  %s1459_s3 = inlined_call_operand.vmem [shape: f32[1,32], index: 3, kind: input, shape index: {}]   ;;  %s1460_s4 = inlined_call_operand.hbm [shape: f32[16,128], index: 4, kind: output, shape index: {}]  }
   0x1   :  { %11 = vsyncpa [#allocation3 + $0x1], 0 }
   0x2   :  { %12 = vsyncpa [#allocation4], 0 }
   0x3   :  { %14 = vsyncpa [#allocation4 + $0x1], 0  ;;  %s1151_s15 = smov 0   ;;  %s1153_s16 = smov 0  }
   0x4   :  { %s1155_s17 = smov 0   ;;  %s1157_s18 = smov 0  }
   0x5 LB: > { %s1172_s19 = sadd.s32 4294967295, %s1119_s18   ;;  %s802_s20 = sadd.s32 4294967294, %s1119_s18   ;;  %s1119_s18 = sphi %s1157_s18, %s1473_s18   ;;  %s1115_s17 = sphi %s1155_s17, %s1472_s17   ;;  %s1111_s16 = sphi %s1153_s16, %s1471_s16   ;;  %s1107_s15 = sphi %s1151_s15, %s1470_s15  }
   0x6   : > { %s1176_s21 = sadd.s32 1, %s1119_s18   ;;  %s27_s22 = sadd.s32 1, %s1115_s17 }
   0x7   : > { %s24_s23 = ssub.s32 %s1119_s18, %s1176_s21  ;;  %p34_p0 = scmp.ne.s32.totalorder %s1115_s17, %s1111_s16 }
   0x8   : > { %p25_p1 = scmp.eq.s32.totalorder %s24_s23, 0  ;;  %p35_p2 = scmp.eq.s32.totalorder %s1119_s18, 0 }
   0x9   : > { %p40_p3 = scmp.ne.s32.totalorder %s1111_s16, %s1107_s15  ;;  %p41_p4 = scmp.eq.s32.totalorder %s1172_s19, 0 }
   0xa   : > { %s1188_s24 = scalar_select %p25_p1, %s1115_s17, %s27_s22  }
   0xb   : > { %p1190_p5 = por %p35_p2, %p34_p0  ;;  %p1194_p6 = por %p41_p4, %p40_p3 }
   0xc   : > { %p127_p7 = scmp.eq.s32.totalorder %s1172_s19, 1  ;;  %p133_p8 = scmp.eq.s32.totalorder %s802_s20, 1 }
   0xd   : > { %p898_p10 = scmp.lt.s32.totalorder %s1119_s18, 2  ;;  %s162_s29 = sand.u32 1, %s1115_s17  }
   0xe   : > { %p1201_p11 = por %p127_p7, %p34_p0  ;;  %p1205_p12 = por %p133_p8, %p40_p3 }
   0xf   : > { %s833_s30 = sshll.u32 %s1119_s18, 10  ;;  %s805_s5 = sshll.u32 %s162_s29, 6 }
  0x10   : > { %s1464_s27 = scalar_select %p1201_p11, 1, 0 }
  0x11   : > { %s1465_s28 = scalar_select %p1205_p12, 1, 0 }
  0x12   : > { %s1214_s8 = scalar_lea.hbm %s1456_s0, %s833_s30  ;;  %s166_s9 = scalar_lea.vmem [#allocation2], %s805_s5 }
  0x13   : > { %s173_s10 = sshll.u32 %s166_s9, 4  ;;  %p1218_p13 = pnand %p898_p10, %p1190_p5  ;;  %s1222_s10 = int_to_ptr.vmem [resolvable:$true] %s173_s10 }
  0x14   : > { %s1224_s12 = scalar_lea.sflag [#allocation3], %s162_s29  ;;  %s1023_s13 = scalar_lea.hbm %s1214_s8, 1024 }
  0x15   : > { %p1024_p0 = scmp.ne.s32.totalorder %s1214_s8, %s1023_s13  ;;  %p1025_p1 = pneg %p1218_p13 }
  0x16   : > { %s1028_s22 = scalar_lea.hbm %s1456_s0, 2048  ;;  %p1029_p4 = scmp.lt.u32.totalorder %s1214_s8, %s1456_s0 }
  0x17   : > { %p1026_p2 = pnand %p1025_p1, %p1024_p0  ;;  %p1030_p5 = scmp.lt.u32.totalorder %s1028_s22, %s1023_s13 }
  0x18   : > { %p1032_p8 = scmp.lt.u32.totalorder %s1023_s13, %s1214_s8 }
  0x19   : > { %p1027_p3 = pneg %p1026_p2  ;;  %p1031_p7 = por %p1030_p5, %p1029_p4 }
  0x1b   : > { %p1033_p10 = por %p1032_p8, %p1031_p7 }
  0x1d   : > { %p1034_p9 = pnand %p1033_p10, %p1027_p3 }
  0x1f   : > { %1037 = shalt.err (!%p1034_p9)
}
  0x20   : > { %s1038_s29 = scalar_lea.vmem %s1222_s10, 1024  ;;  %s1121_s30 = smov [#allocation2]  }
  0x21   : > { %p1039_p0 = scmp.ne.s32.totalorder %s1222_s10, %s1038_s29  ;;  %s1043_s5 = sshll.u32 %s1121_s30, 4  ;;  %s1044_s5 = int_to_ptr.vmem [resolvable:$false] %s1043_s5 }
  0x22   : > { %s1045_s6 = scalar_lea.vmem %s1044_s5, 2048  ;;  %p1046_p11 = scmp.lt.s32.totalorder %s1222_s10, %s1044_s5 }
  0x23   : > { %p1041_p2 = pnand %p1039_p0, %p1025_p1  ;;  %p1047_p4 = scmp.lt.s32.totalorder %s1045_s6, %s1038_s29 }
  0x25   : > { %p1042_p12 = pneg %p1041_p2  ;;  %p1048_p5 = por %p1047_p4, %p1046_p11 }
  0x27   : > { %p1049_p7 = pnand %p1048_p5, %p1042_p12 }
  0x29   : > { %1052 = shalt.err (!%p1049_p7)
}
  0x2a   : > { %s1122_s7 = smov 128   ;;  %s1123_s9 = smov 8  }
  0x2b   : > { %893 = dma.hbm_to_vmem [thread:$0]  (!%p1218_p13), %s1214_s8, 1024, %s1222_s10, %s1224_s12, %s1122_s7, %s1122_s7, %s1123_s9  }
  0x2c   : > { %p808_p9 = scmp.ge.s32.totalorder %s1119_s18, 1  ;;  %p181_p1 = scmp.lt.s32.totalorder %s1119_s18, 3 }
  0x2e   : > { %p182_p3 = pnand %p808_p9, %p181_p1 }
  0x2f   : > { %s1255_s13 = sand.u32 (!%p182_p3), 1, %s1111_s16  }
  0x30   : > { %185 = sbr.rel (%p182_p3) target bundleno = 692 (0x2b4), region = 36  ;;  %s809_s14 = sshll.u32 (!%p182_p3), %s1255_s13, 6 }
  0x31   : > { %s188_s20 = scalar_lea.sflag (!%p182_p3), [#allocation3], %s1255_s13  ;;  %s1259_s22 = scalar_lea.vmem (!%p182_p3), [#allocation2], %s809_s14 }
  0x37   : > { %1098 = dma.done.wait (%p1194_p6), %s188_s20, 1024  }
  0x38   : > { %1100 = vsyncadd (%p1194_p6), %s188_s20, 4294966272  ;;  %v935_v0 = vld [vmem:[%s1457_s1] sm:$0xff]   ;;  %v936_v1 = vld [vmem:[%s1457_s1 + $0x8] sm:$0xff]   ;;  %vm477_vm0 = vcmask 261120   ;;  %vm702_vm1 = vcmask 1041409   ;;  %vm704_vm2 = vcmask 1042434  }
  0x39   : > { %846 = vmatprep.subr.bf16.mxu0 %v935_v0  ;;  %870 = vmatprep.subr.bf16.mxu1 %v935_v0  ;;  %v937_v2 = vld [vmem:[%s1457_s1 + $0x10] sm:$0xff]   ;;  %v938_v3 = vld [vmem:[%s1457_s1 + $0x18] sm:$0xff]   ;;  %v1278_v4 = vld [vmem:[%s1259_s22] sm:$0xff]  ;;  %vm706_vm3 = vcmask 1043459   ;;  %s810_s26 = sshll.u32 %s1255_s13, 3  ;;  %vm708_vm4 = vcmask 1044484  }
  0x3a   : > { %847 = vmatpush3.bf16.msra.mxu0 %v935_v0  ;;  %878 = vmatpush3.bf16.msra.mxu1 %v935_v0  ;;  %v1281_v5 = vld [vmem:[%s1259_s22 + $0x8] sm:$0xff]  ;;  %v1286_v7 = vld [vmem:[%s1259_s22 + $0x20] sm:$0xff]  ;;  %v941_v12 = vld [vmem:[%s1457_s1 + $0x30] sm:$0xff]   ;;  %vm710_vm5 = vcmask 1045509   ;;  %vm712_vm6 = vcmask 1046534   ;;  %s830_s25 = sshll.u32 %s1172_s19, 7 }
  0x3b   : > { %848 = vmatprep.subr.bf16.mxu0 %v936_v1  ;;  %871 = vmatprep.subr.bf16.mxu1 %v936_v1  ;;  %v226_v6 = vpack.c.bf16 %v1281_v5, %v1278_v4  ;;  %v1289_v8 = vld [vmem:[%s1259_s22 + $0x28] sm:$0xff]  ;;  %v939_v10 = vld [vmem:[%s1457_s1 + $0x20] sm:$0xff]   ;;  %v942_v13 = vld [vmem:[%s1457_s1 + $0x38] sm:$0xff]   ;;  %s215_s29 = scalar_lea.vmem [#allocation5], %s810_s26  ;;  %vm714_vm7 = vcmask 1047559   ;;  %s1412_s7 = scalar_lea.hbm %s1460_s4, %s830_s25 }
  0x3c   : > { %v228_v9 = vpack.c.bf16 %v1289_v8, %v1286_v7  ;;  %v940_v11 = vld [vmem:[%s1457_s1 + $0x28] sm:$0xff]   ;;  %v1306_v14 = vld [vmem:[%s1259_s22 + $0x10] sm:$0xff]  ;;  %v1309_v15 = vld [vmem:[%s1259_s22 + $0x18] sm:$0xff]  ;;  %s732_s30 = sshll.u32 %s215_s29, 4  ;;  %s719_s9 = scalar_lea.sflag [#allocation4], %s1255_s13  ;;  %s1414_s30 = int_to_ptr.vmem [resolvable:$true] %s732_s30 }
  0x3d   : > { %862 = vmatprep.mubr.bf16.mxu0 %v226_v6  ;;  %v1312_v16 = vld [vmem:[%s1259_s22 + $0x30] sm:$0xff]  ;;  %v1315_v17 = vld [vmem:[%s1259_s22 + $0x38] sm:$0xff]  ;;  %v227_v18 = vpack.c.bf16 %v1309_v15, %v1306_v14  ;;  %v811_v20 = vld [vmem:[%s1458_s2] ss:$0 sm:$0xff]  ;;  %s1124_s22 = smov 96   ;;  %s1053_s14 = scalar_lea.vmem %s1414_s30, 128 }
  0x3e   : > { %849 = vmatpush3.bf16.msra.mxu0 %v936_v1  ;;  %879 = vmatpush3.bf16.msra.mxu1 %v936_v1  ;;  %v229_v19 = vpack.c.bf16 %v1315_v17, %v1312_v16  ;;  %p1054_p6 = scmp.ne.s32.totalorder %s1414_s30, %s1053_s14  ;;  %p1467_p11 = scmp.ne.s32.totalorder %s1464_s27, 0 }
  0x3f   : > { %850 = vmatprep.subr.bf16.mxu0 %v937_v2  ;;  %872 = vmatprep.subr.bf16.mxu1 %v937_v2  ;;  %s1125_s19 = smov [#allocation5]  }
  0x40   : > { %866 = vmatprep.mubr.bf16.mxu1 %v228_v9  ;;  %p1055_p12 = pnand %p1054_p6, %p1467_p11  ;;  %s1057_s20 = sshll.u32 %s1125_s19, 4  ;;  %s1058_s20 = int_to_ptr.vmem [resolvable:$false] %s1057_s20 }
  0x41   : > { %s1059_s8 = scalar_lea.vmem %s1058_s20, 256  ;;  %p1060_p8 = scmp.lt.s32.totalorder %s1414_s30, %s1058_s20 }
  0x42   : > { %851 = vmatpush3.bf16.msra.mxu0 %v937_v2  ;;  %880 = vmatpush3.bf16.msra.mxu1 %v937_v2  ;;  %p1056_p13 = pneg %p1055_p12  ;;  %p1061_p10 = scmp.lt.s32.totalorder %s1059_s8, %s1053_s14 }
  0x43   : > { %852 = vmatprep.subr.bf16.mxu0 %v938_v3  ;;  %873 = vmatprep.subr.bf16.mxu1 %v938_v3 }
  0x44   : > { %p1062_p0 = por %p1061_p10, %p1060_p8 }
  0x46   : > { %853 = vmatpush3.bf16.msra.mxu0 %v938_v3  ;;  %881 = vmatpush3.bf16.msra.mxu1 %v938_v3  ;;  %p1063_p2 = pnand %p1062_p0, %p1056_p13 }
  0x47   : > { %854 = vmatprep.subr.bf16.mxu0 %v939_v10  ;;  %874 = vmatprep.subr.bf16.mxu1 %v939_v10 }
  0x4a   : > { %855 = vmatpush3.bf16.msra.mxu0 %v939_v10  ;;  %882 = vmatpush3.bf16.msra.mxu1 %v939_v10 }
  0x4b   : > { %856 = vmatprep.subr.bf16.mxu0 %v940_v11  ;;  %875 = vmatprep.subr.bf16.mxu1 %v940_v11 }
  0x4e   : > { %857 = vmatpush3.bf16.msra.mxu0 %v940_v11  ;;  %883 = vmatpush3.bf16.msra.mxu1 %v940_v11  ;;  %v828_v11 = vld [vmem:[%s1459_s3] ss:$0 sm:$0xff] }
  0x4f   : > { %858 = vmatprep.subr.bf16.mxu0 %v941_v12  ;;  %876 = vmatprep.subr.bf16.mxu1 %v941_v12 }
  0x52   : > { %859 = vmatpush3.bf16.msra.mxu0 %v941_v12  ;;  %884 = vmatpush3.bf16.msra.mxu1 %v941_v12 }
  0x53   : > { %860 = vmatprep.subr.bf16.mxu0 %v942_v13  ;;  %877 = vmatprep.subr.bf16.mxu1 %v942_v13 }
  0x56   : > { %861 = vmatpush3.bf16.msra.mxu0 %v942_v13  ;;  %885 = vmatpush3.bf16.msra.mxu1 %v942_v13 }
  0x59   : > { %863 = vmatmul.mubr.bf16.vlgmr.msra.gmra.mrb[0].mxu0 %v227_v18  ;;  %867 = vmatmul.mubr.bf16.vlgmr.msra.gmra.mrb[0].mxu1 %v229_v19 }
 0x12c   : > { %v864_v21 = vpop.f32.mrb[0].mxu0  ;;  %v868_v22 = vpop.f32.mrb[0].mxu1 }
 0x12d   : > { %v1324_v23 = vadd.f32 %v864_v21, %v811_v20  ;;  %v335_v24 = vpop.f32.mrb[1].mxu0  ;;  %v351_v25 = vpop.f32.mrb[1].mxu1  ;;  %v1333_v36 = vadd.f32 %v868_v22, %v811_v20 }
 0x12e   : > { %v1326_v26 = vadd.f32 %v811_v20, %v335_v24  ;;  %v865_v27 = vpop.f32.mrb[2].mxu0  ;;  %v869_v28 = vpop.f32.mrb[2].mxu1  ;;  %v352_v38 = vadd.f32 %v811_v20, %v351_v25 }
 0x12f   : > { %v822_v29 = vmul.f32 -1.442695, %v1324_v23  ;;  %v1329_v30 = vadd.f32 %v865_v27, %v811_v20  ;;  %v338_v31 = vpop.f32.mrb[3].mxu0  ;;  %v354_v32 = vpop.f32.mrb[3].mxu1  ;;  %v826_v39 = vmul.f32 -1.442695, %v1333_v36  ;;  %v1336_v40 = vadd.f32 %v869_v28, %v811_v20 }
 0x130   : > { %v820_v33 = vmul.f32 -1.442695, %v1326_v26  ;;  %v339_v34 = vadd.f32 %v811_v20, %v338_v31  ;;  %v824_v41 = vmul.f32 -1.442695, %v352_v38  ;;  %v1338_v42 = vadd.f32 %v811_v20, %v354_v32 }
 0x131   : > { %943 = vpow2.f32 %v822_v29  ;;  %v823_v35 = vmul.f32 -1.442695, %v1329_v30  ;;  %v827_v43 = vmul.f32 -1.442695, %v1336_v40 }
 0x132   : > { %945 = vpow2.f32 %v820_v33  ;;  %v821_v37 = vmul.f32 -1.442695, %v339_v34  ;;  %v825_v47 = vmul.f32 -1.442695, %v1338_v42 }
 0x133   : > { %947 = vpow2.f32 %v823_v35 }
 0x134   : > { %949 = vpow2.f32 %v821_v37 }
 0x135   : > { %951 = vpow2.f32 %v826_v39 }
 0x136   : > { %953 = vpow2.f32 %v824_v41 }
 0x137   : > { %955 = vpow2.f32 %v827_v43 }
 0x13b   : > { %v944_v44 = vpop.eup %943 }
 0x13c   : > { %v946_v45 = vpop.eup %945  ;;  %v400_v46 = vadd.f32 1.0, %v944_v44 }
 0x13d   : > { %v398_v48 = vadd.f32 1.0, %v946_v45  ;;  %v948_v49 = vpop.eup %947 }
 0x13e   : > { %957 = vrcp.f32 %v400_v46  ;;  %v401_v50 = vadd.f32 1.0, %v948_v49  ;;  %v950_v51 = vpop.eup %949 }
 0x13f   : > { %959 = vrcp.f32 %v398_v48  ;;  %v399_v52 = vadd.f32 1.0, %v950_v51  ;;  %v952_v53 = vpop.eup %951 }
 0x140   : > { %961 = vpow2.f32 %v825_v47  ;;  %v954_v54 = vpop.eup %953  ;;  %v404_v57 = vadd.f32 1.0, %v952_v53 }
 0x141   : > { %963 = vrcp.f32 %v401_v50  ;;  %v402_v55 = vadd.f32 1.0, %v954_v54  ;;  %v956_v56 = vpop.eup %955 }
 0x142   : > { %965 = vrcp.f32 %v399_v52  ;;  %v405_v0 = vadd.f32 1.0, %v956_v56 }
 0x143   : > { %967 = vrcp.f32 %v402_v55 }
 0x144   : > { %969 = vrcp.f32 %v404_v57 }
 0x148   : > { %v958_v58 = vpop.eup %957 }
 0x149   : > { %v960_v59 = vpop.eup %959  ;;  %434 = vrot.lane.b32.xlu1 %v958_v58, %s1124_s22 }
 0x14a   : > { %v962_v60 = vpop.eup %961  ;;  %430 = vrot.lane.b32.xlu0 %v960_v59, %s1124_s22 }
 0x14b   : > { %v403_v61 = vadd.f32 1.0, %v962_v60  ;;  %v964_v62 = vpop.eup %963 }
 0x14c   : > { %v966_v63 = vpop.eup %965 }
 0x14d   : > { %971 = vrcp.f32 %v403_v61  ;;  %436 = vrot.lane.b32.xlu1 %v964_v62, %s1124_s22  ;;  %v968_v1 = vpop.eup %967 }
 0x14e   : > { %432 = vrot.lane.b32.xlu0 %v966_v63, %s1124_s22  ;;  %973 = vrcp.f32 %v405_v0  ;;  %v970_v2 = vpop.eup %969 }
 0x14f   : > { %975 = vtanh.f32 %v1324_v23 }
 0x150   : > { %977 = vtanh.f32 %v1326_v26 }
 0x151   : > { %979 = vtanh.f32 %v1329_v30 }
 0x152   : > { %438 = vrot.lane.b32.xlu0 %v968_v1, %s1124_s22  ;;  %981 = vtanh.f32 %v339_v34 }
 0x153   : > { %983 = vtanh.f32 %v352_v38 }
 0x154   : > { %985 = vtanh.f32 %v1333_v36 }
 0x155   : > { %987 = vtanh.f32 %v1338_v42 }
 0x156   : > { %442 = vrot.lane.b32.xlu0 %v970_v2, %s1124_s22  ;;  %989 = vtanh.f32 %v1336_v40 }
 0x157   : > { %v972_v3 = vpop.eup %971 }
 0x158   : > { %440 = vrot.lane.b32.xlu1 %v972_v3, %s1124_s22  ;;  %v974_v6 = vpop.eup %973 }
 0x159   : > { %v976_v9 = vpop.eup %975 }
 0x15a   : > { %v978_v12 = vpop.eup %977 }
 0x15b   : > { %v980_v21 = vpop.eup %979 }
 0x15c   : > { %444 = vrot.lane.b32.xlu1 %v974_v6, %s1124_s22  ;;  %v982_v23 = vpop.eup %981 }
 0x15d   : > { %v984_v30 = vpop.eup %983 }
 0x15e   : > { %v986_v37 = vpop.eup %985 }
 0x15f   : > { %v988_v43 = vpop.eup %987 }
 0x160   : > { %v990_v48 = vpop.eup %989 }
 0x1bb   : > { %v435_v10 = vpop.permute.xlu1 %434 }
 0x1bc   : > { %v456_v13 = vmul.f32 %v976_v9, %v435_v10  ;;  %v431_v18 = vpop.permute.xlu0 %430 }
 0x1bd   : > { %v454_v19 = vmul.f32 %v978_v12, %v431_v18 }
 0x1be   : > { %v471_v20 = vmul.f32 %v828_v11, %v456_v13 }
 0x1bf   : > { %v437_v22 = vpop.permute.xlu1 %436  ;;  %v469_v27 = vmul.f32 %v828_v11, %v454_v19 }
 0x1c0   : > { %v457_v24 = vmul.f32 %v980_v21, %v437_v22  ;;  %v433_v25 = vpop.permute.xlu0 %432  ;;  %v484_v26 = vsel %vm477_vm0, %v471_v20, 0.0 }
 0x1c1   : > { %v455_v28 = vmul.f32 %v982_v23, %v433_v25  ;;  %485 = vadd.xlane.f32.xlu0 %v484_v26  ;;  %v478_v32 = vsel %vm477_vm0, %v469_v27, 0.0 }
 0x1c2   : > { %v472_v33 = vmul.f32 %v828_v11, %v457_v24 }
 0x1c3   : > { %v470_v29 = vmul.f32 %v828_v11, %v455_v28 }
 0x1c4   : > { %v439_v31 = vpop.permute.xlu0 %438  ;;  %v487_v39 = vsel %vm477_vm0, %v472_v33, 0.0 }
 0x1c5   : > { %v458_v34 = vmul.f32 %v984_v30, %v439_v31  ;;  %479 = vadd.xlane.f32.xlu0 %v478_v32  ;;  %v481_v35 = vsel %vm477_vm0, %v470_v29, 0.0 }
 0x1c6   : > { %482 = vadd.xlane.f32.xlu1 %v481_v35 }
 0x1c7   : > { %v473_v36 = vmul.f32 %v828_v11, %v458_v34 }
 0x1c8   : > { %v443_v38 = vpop.permute.xlu0 %442 }
 0x1c9   : > { %v460_v41 = vmul.f32 %v986_v37, %v443_v38  ;;  %488 = vadd.xlane.f32.xlu0 %v487_v39  ;;  %v490_v42 = vsel %vm477_vm0, %v473_v36, 0.0 }
 0x1ca   : > { %v441_v40 = vpop.permute.xlu1 %440  ;;  %491 = vadd.xlane.f32.xlu1 %v490_v42 }
 0x1cb   : > { %v459_v44 = vmul.f32 %v988_v43, %v441_v40  ;;  %v475_v45 = vmul.f32 %v828_v11, %v460_v41 }
 0x1cd   : > { %v474_v46 = vmul.f32 %v828_v11, %v459_v44  ;;  %v496_v47 = vsel %vm477_vm0, %v475_v45, 0.0 }
 0x1ce   : > { %v445_v49 = vpop.permute.xlu1 %444  ;;  %497 = vadd.xlane.f32.xlu1 %v496_v47 }
 0x1cf   : > { %v461_v50 = vmul.f32 %v990_v48, %v445_v49  ;;  %v493_v51 = vsel %vm477_vm0, %v474_v46, 0.0 }
 0x1d0   : > { %494 = vadd.xlane.f32.xlu0 %v493_v51 }
 0x1d1   : > { %v476_v52 = vmul.f32 %v828_v11, %v461_v50 }
 0x1d3   : > { %v499_v53 = vsel %vm477_vm0, %v476_v52, 0.0 }
 0x1d4   : > { %500 = vadd.xlane.f32.xlu0 %v499_v53 }
 0x24e   : > { %v486_v54 = vpop.xlane.xlu0 %485 }
 0x24f   : > { %v514_v55 = vrot.slane %v486_v54, 4 }
 0x251   : > { %v515_v56 = vmax.f32 %v486_v54, %v514_v55 }
 0x252   : > { %v480_v57 = vpop.xlane.xlu0 %479 }
 0x253   : > { %v516_v58 = vrot.slane %v515_v56, 2  ;;  %v502_v59 = vrot.slane %v480_v57, 4  ;;  %v483_v60 = vpop.xlane.xlu1 %482 }
 0x254   : > { %v508_v61 = vrot.slane %v483_v60, 4 }
 0x255   : > { %v517_v62 = vmax.f32 %v515_v56, %v516_v58  ;;  %v503_v63 = vmax.f32 %v480_v57, %v502_v59 }
 0x256   : > { %v509_v0 = vmax.f32 %v483_v60, %v508_v61  ;;  %v489_v1 = vpop.xlane.xlu0 %488 }
 0x257   : > { %v518_v2 = vrot.slane %v517_v62, 1  ;;  %v504_v3 = vrot.slane %v503_v63, 2  ;;  %v520_v6 = vrot.slane %v489_v1, 4  ;;  %v492_v9 = vpop.xlane.xlu1 %491 }
 0x258   : > { %v510_v10 = vrot.slane %v509_v0, 2  ;;  %v526_v11 = vrot.slane %v492_v9, 4 }
 0x259   : > { %v519_v12 = vmax.f32 %v517_v62, %v518_v2  ;;  %v505_v13 = vmax.f32 %v503_v63, %v504_v3  ;;  %v521_v18 = vmax.f32 %v489_v1, %v520_v6 }
 0x25a   : > { %v511_v19 = vmax.f32 %v509_v0, %v510_v10  ;;  %v527_v20 = vmax.f32 %v492_v9, %v526_v11 }
 0x25b   : > { %v552_v21 = vsub.f32 %v486_v54, %v519_v12  ;;  %v506_v22 = vrot.slane %v505_v13, 1  ;;  %v522_v23 = vrot.slane %v521_v18, 2  ;;  %v498_v24 = vpop.xlane.xlu1 %497 }
 0x25c   : > { %v512_v25 = vrot.slane %v511_v19, 1  ;;  %v528_v26 = vrot.slane %v527_v20, 2  ;;  %v538_v27 = vrot.slane %v498_v24, 4 }
 0x25d   : > { %v562_v28 = vmul.f32 1.442695, %v552_v21  ;;  %v507_v29 = vmax.f32 %v505_v13, %v506_v22  ;;  %v523_v30 = vmax.f32 %v521_v18, %v522_v23  ;;  %v495_v31 = vpop.xlane.xlu0 %494 }
 0x25e   : > { %v513_v32 = vmax.f32 %v511_v19, %v512_v25  ;;  %v529_v33 = vmax.f32 %v527_v20, %v528_v26  ;;  %v532_v34 = vrot.slane %v495_v31, 4  ;;  %v539_v35 = vmax.f32 %v498_v24, %v538_v27 }
 0x25f   : > { %991 = vpow2.f32 %v562_v28  ;;  %v550_v36 = vsub.f32 %v480_v57, %v507_v29  ;;  %v524_v37 = vrot.slane %v523_v30, 1 }
 0x260   : > { %v551_v38 = vsub.f32 %v483_v60, %v513_v32  ;;  %v530_v39 = vrot.slane %v529_v33, 1  ;;  %v533_v41 = vmax.f32 %v495_v31, %v532_v34  ;;  %v540_v42 = vrot.slane %v539_v35, 2 }
 0x261   : > { %v558_v43 = vmul.f32 1.442695, %v550_v36  ;;  %v525_v40 = vmax.f32 %v523_v30, %v524_v37  ;;  %v501_v44 = vpop.xlane.xlu0 %500 }
 0x262   : > { %v560_v45 = vmul.f32 1.442695, %v551_v38  ;;  %v531_v46 = vmax.f32 %v529_v33, %v530_v39  ;;  %v534_v47 = vrot.slane %v533_v41, 2  ;;  %v541_v48 = vmax.f32 %v539_v35, %v540_v42 }
 0x263   : > { %993 = vpow2.f32 %v558_v43  ;;  %v553_v49 = vsub.f32 %v489_v1, %v525_v40  ;;  %v544_v50 = vrot.slane %v501_v44, 4 }
 0x264   : > { %995 = vpow2.f32 %v560_v45  ;;  %v554_v51 = vsub.f32 %v492_v9, %v531_v46  ;;  %v535_v52 = vmax.f32 %v533_v41, %v534_v47  ;;  %v542_v53 = vrot.slane %v541_v48, 1 }
 0x265   : > { %v564_v54 = vmul.f32 1.442695, %v553_v49  ;;  %v545_v55 = vmax.f32 %v501_v44, %v544_v50 }
 0x266   : > { %v566_v56 = vmul.f32 1.442695, %v554_v51  ;;  %v536_v57 = vrot.slane %v535_v52, 1  ;;  %v543_v58 = vmax.f32 %v541_v48, %v542_v53 }
 0x267   : > { %997 = vpow2.f32 %v564_v54  ;;  %v546_v59 = vrot.slane %v545_v55, 2 }
 0x268   : > { %999 = vpow2.f32 %v566_v56  ;;  %v537_v60 = vmax.f32 %v535_v52, %v536_v57  ;;  %v556_v61 = vsub.f32 %v498_v24, %v543_v58 }
 0x269   : > { %v1359_v62 = vpop.eup %991  ;;  %v547_v63 = vmax.f32 %v545_v55, %v546_v59 }
 0x26a   : > { %v586_v0 = vrot.slane %v1359_v62, 4  ;;  %v555_v1 = vsub.f32 %v495_v31, %v537_v60  ;;  %v570_v2 = vmul.f32 1.442695, %v556_v61 }
 0x26b   : > { %v548_v3 = vrot.slane %v547_v63, 1 }
 0x26c   : > { %v587_v6 = vadd.f32 %v1359_v62, %v586_v0  ;;  %v568_v9 = vmul.f32 1.442695, %v555_v1  ;;  %1001 = vpow2.f32 %v570_v2 }
 0x26d   : > { %v1363_v10 = vpop.eup %993  ;;  %v549_v11 = vmax.f32 %v547_v63, %v548_v3 }
 0x26e   : > { %v1365_v12 = vpop.eup %995  ;;  %v588_v13 = vrot.slane %v587_v6, 2  ;;  %v574_v18 = vrot.slane %v1363_v10, 4  ;;  %1003 = vpow2.f32 %v568_v9 }
 0x26f   : > { %v580_v19 = vrot.slane %v1365_v12, 4  ;;  %v557_v20 = vsub.f32 %v501_v44, %v549_v11 }
 0x270   : > { %v589_v21 = vadd.f32 %v588_v13, %v587_v6  ;;  %v575_v22 = vadd.f32 %v1363_v10, %v574_v18 }
 0x271   : > { %v1370_v23 = vpop.eup %997  ;;  %v581_v24 = vadd.f32 %v1365_v12, %v580_v19  ;;  %v572_v25 = vmul.f32 1.442695, %v557_v20 }
 0x272   : > { %v1373_v26 = vpop.eup %999  ;;  %v590_v27 = vrot.slane %v589_v21, 1  ;;  %v576_v28 = vrot.slane %v575_v22, 2  ;;  %v592_v29 = vrot.slane %v1370_v23, 4 }
 0x273   : > { %v582_v30 = vrot.slane %v581_v24, 2  ;;  %v598_v31 = vrot.slane %v1373_v26, 4  ;;  %1005 = vpow2.f32 %v572_v25 }
 0x274   : > { %v591_v32 = vadd.f32 %v590_v27, %v589_v21  ;;  %v577_v33 = vadd.f32 %v576_v28, %v575_v22  ;;  %v593_v34 = vadd.f32 %v1370_v23, %v592_v29 }
 0x275   : > { %v583_v35 = vadd.f32 %v582_v30, %v581_v24  ;;  %v599_v36 = vadd.f32 %v1373_v26, %v598_v31 }
 0x276   : > { %v1379_v37 = vpop.eup %1001  ;;  %1007 = vrcp.f32 %v591_v32  ;;  %v578_v38 = vrot.slane %v577_v33, 1  ;;  %v594_v39 = vrot.slane %v593_v34, 2 }
 0x277   : > { %v584_v41 = vrot.slane %v583_v35, 1  ;;  %v600_v42 = vrot.slane %v599_v36, 2  ;;  %v610_v43 = vrot.slane %v1379_v37, 4 }
 0x278   : > { %v1382_v40 = vpop.eup %1003  ;;  %v579_v44 = vadd.f32 %v578_v38, %v577_v33  ;;  %v595_v45 = vadd.f32 %v594_v39, %v593_v34 }
 0x279   : > { %v585_v46 = vadd.f32 %v584_v41, %v583_v35  ;;  %v601_v47 = vadd.f32 %v600_v42, %v599_v36  ;;  %v604_v48 = vrot.slane %v1382_v40, 4  ;;  %v611_v49 = vadd.f32 %v1379_v37, %v610_v43 }
 0x27a   : > { %1009 = vrcp.f32 %v579_v44  ;;  %v596_v50 = vrot.slane %v595_v45, 1 }
 0x27b   : > { %1011 = vrcp.f32 %v585_v46  ;;  %v602_v51 = vrot.slane %v601_v47, 1  ;;  %v605_v52 = vadd.f32 %v1382_v40, %v604_v48  ;;  %v612_v53 = vrot.slane %v611_v49, 2 }
 0x27c   : > { %v597_v54 = vadd.f32 %v596_v50, %v595_v45 }
 0x27d   : > { %v1387_v55 = vpop.eup %1005  ;;  %v603_v56 = vadd.f32 %v602_v51, %v601_v47  ;;  %v606_v57 = vrot.slane %v605_v52, 2  ;;  %v613_v58 = vadd.f32 %v612_v53, %v611_v49 }
 0x27e   : > { %1013 = vrcp.f32 %v597_v54  ;;  %v616_v59 = vrot.slane %v1387_v55, 4 }
 0x27f   : > { %1015 = vrcp.f32 %v603_v56  ;;  %v607_v60 = vadd.f32 %v606_v57, %v605_v52  ;;  %v614_v61 = vrot.slane %v613_v58, 1 }
 0x280   : > { %v1008_v63 = vpop.eup %1007  ;;  %v617_v0 = vadd.f32 %v1387_v55, %v616_v59 }
 0x281   : > { %v632_v1 = vmul.f32 %v1008_v63, %v1359_v62  ;;  %v608_v2 = vrot.slane %v607_v60, 1  ;;  %v615_v3 = vadd.f32 %v614_v61, %v613_v58 }
 0x282   : > { %v618_v6 = vrot.slane %v617_v0, 2 }
 0x283   : > { %v609_v9 = vadd.f32 %v608_v2, %v607_v60  ;;  %1017 = vrcp.f32 %v615_v3  ;;  %v640_v11 = vmul.f32 %v632_v1, %v1306_v14 }
 0x284   : > { %v1010_v13 = vpop.eup %1009  ;;  %v619_v18 = vadd.f32 %v618_v6, %v617_v0 }
 0x285   : > { %v1012_v19 = vpop.eup %1011  ;;  %v630_v20 = vmul.f32 %v1010_v13, %v1363_v10  ;;  %1019 = vrcp.f32 %v609_v9  ;;  %v658_v21 = vrot.slane %v640_v11, 4 }
 0x286   : > { %v631_v22 = vmul.f32 %v1012_v19, %v1365_v12  ;;  %v620_v24 = vrot.slane %v619_v18, 1 }
 0x287   : > { %v638_v25 = vmul.f32 %v630_v20, %v1278_v4  ;;  %v659_v62 = vadd.f32 %v658_v21, %v640_v11 }
 0x288   : > { %v1014_v27 = vpop.eup %1013  ;;  %v639_v28 = vmul.f32 %v631_v22, %v1281_v5  ;;  %v621_v29 = vadd.f32 %v620_v24, %v619_v18 }
 0x289   : > { %v1016_v30 = vpop.eup %1015  ;;  %v633_v14 = vmul.f32 %v1014_v27, %v1370_v23  ;;  %v646_v31 = vrot.slane %v638_v25, 4  ;;  %v660_v12 = vrot.slane %v659_v62, 2 }
 0x28a   : > { %1021 = vrcp.f32 %v621_v29  ;;  %v634_v32 = vmul.f32 %v1016_v30, %v1373_v26  ;;  %v652_v10 = vrot.slane %v639_v28, 4 }
 0x28b   : > { %v641_v33 = vmul.f32 %v633_v14, %v1309_v15  ;;  %v647_v34 = vadd.f32 %v646_v31, %v638_v25  ;;  %v661_v44 = vadd.f32 %v660_v12, %v659_v62 }
 0x28c   : > { %v642_v35 = vmul.f32 %v634_v32, %v1286_v7  ;;  %v653_v4 = vadd.f32 %v652_v10, %v639_v28 }
 0x28d   : > { %v1018_v36 = vpop.eup %1017  ;;  %v648_v38 = vrot.slane %v647_v34, 2  ;;  %v664_v39 = vrot.slane %v641_v33, 4  ;;  %v662_v53 = vrot.slane %v661_v44, 1 }
 0x28e   : > { %v636_v5 = vmul.f32 %v1018_v36, %v1379_v37  ;;  %v654_v41 = vrot.slane %v653_v4, 2  ;;  %v670_v42 = vrot.slane %v642_v35, 4 }
 0x28f   : > { %v1020_v23 = vpop.eup %1019  ;;  %v649_v43 = vadd.f32 %v648_v38, %v647_v34  ;;  %v665_v45 = vadd.f32 %v664_v39, %v641_v33  ;;  %v663_v1 = vadd.f32 %v662_v53, %v661_v44 }
 0x290   : > { %v635_v26 = vmul.f32 %v1020_v23, %v1382_v40  ;;  %v644_v15 = vmul.f32 %v636_v5, %v1312_v16  ;;  %v655_v46 = vadd.f32 %v654_v41, %v653_v4  ;;  %v671_v47 = vadd.f32 %v670_v42, %v642_v35 }
 0x291   : > { %v650_v48 = vrot.slane %v649_v43, 1  ;;  %v666_v7 = vrot.slane %v665_v45, 2 }
 0x292   : > { %v643_v49 = vmul.f32 %v635_v26, %v1289_v8  ;;  %v656_v50 = vrot.slane %v655_v46, 1  ;;  %v672_v51 = vrot.slane %v671_v47, 2  ;;  %v682_v52 = vrot.slane %v644_v15, 4 }
 0x293   : > { %v651_v37 = vadd.f32 %v650_v48, %v649_v43  ;;  %v667_v54 = vadd.f32 %v666_v7, %v665_v45 }
 0x294   : > { %v1022_v56 = vpop.eup %1021  ;;  %v657_v57 = vadd.f32 %v656_v50, %v655_v46  ;;  %v673_v58 = vadd.f32 %v672_v51, %v671_v47  ;;  %v676_v59 = vrot.slane %v643_v49, 4  ;;  %v683_v40 = vadd.f32 %v682_v52, %v644_v15 }
 0x295   : > { %v637_v16 = vmul.f32 %v1022_v56, %v1387_v55  ;;  %v668_v60 = vrot.slane %v667_v54, 1 }
 0x296   : > { %v677_v61 = vadd.f32 %v676_v59, %v643_v49  ;;  %v684_v63 = vrot.slane %v683_v40, 2  ;;  %v703_v0 = vsel %vm702_vm1, %v657_v57, %v651_v37  ;;  %v674_v2 = vrot.slane %v673_v58, 1 }
 0x297   : > { %v645_v8 = vmul.f32 %v637_v16, %v1315_v17  ;;  %v669_v9 = vadd.f32 %v668_v60, %v667_v54  ;;  %v705_v18 = vsel %vm704_vm2, %v663_v1, %v703_v0 }
 0x298   : > { %v678_v3 = vrot.slane %v677_v61, 2  ;;  %v685_v6 = vadd.f32 %v684_v63, %v683_v40  ;;  %v675_v19 = vadd.f32 %v674_v2, %v673_v58 }
 0x299   : > { %v688_v11 = vrot.slane %v645_v8, 4  ;;  %v707_v24 = vsel %vm706_vm3, %v669_v9, %v705_v18 }
 0x29a   : > { %v679_v13 = vadd.f32 %v678_v3, %v677_v61  ;;  %v686_v21 = vrot.slane %v685_v6, 1  ;;  %v709_v27 = vsel %vm708_vm4, %v675_v19, %v707_v24 }
 0x29b   : > { %v689_v55 = vadd.f32 %v688_v11, %v645_v8 }
 0x29c   : > { %v680_v20 = vrot.slane %v679_v13, 1  ;;  %v687_v62 = vadd.f32 %v686_v21, %v685_v6 }
 0x29d   : > { %v690_v22 = vrot.slane %v689_v55, 2 }
 0x29e   : > { %v681_v17 = vadd.f32 %v680_v20, %v679_v13 }
 0x29f   : > { %v691_v25 = vadd.f32 %v690_v22, %v689_v55 }
 0x2a0   : > { %v711_v29 = vsel %vm710_vm5, %v681_v17, %v709_v27 }
 0x2a1   : > { %v692_v28 = vrot.slane %v691_v25, 1  ;;  %v713_v14 = vsel %vm712_vm6, %v687_v62, %v711_v29 }
 0x2a3   : > { %v693_v30 = vadd.f32 %v692_v28, %v691_v25 }
 0x2a5   : > { %v715_v31 = vsel %vm714_vm7, %v693_v30, %v713_v14 }
 0x2a6   : > { %717 = vst [vmem:[%s215_s29] sm:$0xff] %v715_v31 }
 0x2a7   : > { %1066 = shalt.err (!%p1063_p2)
}
 0x2a8   : > { %s1067_s13 = scalar_lea.hbm %s1412_s7, 128  ;;  %s1071_s22 = scalar_lea.hbm %s1460_s4, 256 }
 0x2a9   : > { %p1068_p4 = scmp.ne.s32.totalorder %s1412_s7, %s1067_s13  ;;  %p1072_p9 = scmp.lt.u32.totalorder %s1412_s7, %s1460_s4 }
 0x2aa   : > { %p1073_p1 = scmp.lt.u32.totalorder %s1071_s22, %s1067_s13  ;;  %p1075_p6 = scmp.lt.u32.totalorder %s1067_s13, %s1412_s7 }
 0x2ab   : > { %p1069_p5 = pnand %p1068_p4, %p1467_p11 }
 0x2ac   : > { %p1074_p3 = por %p1073_p1, %p1072_p9 }
 0x2ad   : > { %p1070_p7 = pneg %p1069_p5 }
 0x2ae   : > { %p1076_p12 = por %p1075_p6, %p1074_p3 }
 0x2b0   : > { %p1077_p13 = pnand %p1076_p12, %p1070_p7 }
 0x2b2   : > { %1080 = shalt.err (!%p1077_p13)
}
 0x2b3   : > { %888 = dma.vmem_to_hbm [thread:$0]  (%p1467_p11), %s1414_s30, 128, %s1412_s7, %s719_s9  }
 0x2b4 PF: > { %s744_s26 = sand.u32 1, %s1107_s15   ;;  %p1468_p8 = scmp.ne.s32.totalorder %s1465_s28, 0 }
 0x2b5   : > { %p1469_p10 = scmp.ge.s32.totalorder %s1119_s18, 2  ;;  %s745_s25 = scalar_lea.sflag [#allocation4], %s744_s26 }
 0x2b7   : > { %p895_p0 = pnand %p1469_p10, %p1468_p8 }
 0x2b9   : > { %1102 = dma.done.wait (!%p895_p0), %s745_s25, 128  }
 0x2ba   : > { %1104 = vsyncadd (!%p895_p0), %s745_s25, 4294967168  ;;  %p17_p2 = scmp.ge.s32.totalorder %s1176_s21, 4   ;;  %s1470_s15 = smov %s1111_s16 }
 0x2bb   : > { %s1471_s16 = smov %s1115_s17  ;;  %s1472_s17 = smov %s1188_s24 }
 0x2bc   : > { %s1473_s18 = smov %s1176_s21  ;;  %19 = sbr.rel (!%p17_p2) target bundleno = 5 (0x5), region = 81 }
 0x2c3   :  { %750 = vsyncpa [#allocation3], 1 }
 0x2c4   :  { %752 = vsyncpa [#allocation3 + $0x1], 1 }
 0x2c5   :  { %753 = vsyncpa [#allocation4], 1 }
 0x2c6   :  { %755 = vsyncpa [#allocation4 + $0x1], 1 }

</bundles_post_ra>
